<compile_context>
chip_gen: v7x
topology: tpu7x:2x2x1
jax: 0.10.0
libtpu: 0.0.40
codegen_flags: <defaults>
</compile_context>

<pallas_src>
import jax
import jax.numpy as jnp
import numpy as np
from jax.experimental import pallas as pl
from jax.experimental.pallas import tpu as pltpu

MAX_LENGTH = 10
SOS_token = 0


def decoder_rnn_kernel(mb_ref, out_ref):
    """Full greedy decode loop.

    mb_ref  : (V, V) float32   precomputed relu(emb) @ W^T + b
    out_ref : (B, T, V) float32 log-softmax'd logits for all T steps
    """
    B, T, V = out_ref.shape
    mb = mb_ref[...]                                            # (V, V)

    vocab_iota = jax.lax.broadcasted_iota(jnp.int32, (B, V), 1)
    idx = jnp.full((B, 1), SOS_token, dtype=jnp.int32)          # decoder_input = SOS

    # MAX_LENGTH is a small static constant -> fully unrolled serial loop
    # (each step depends on the previous argmax, so no pipelining possible).
    outs = []
    for _ in range(T):
        # embedding+relu+linear+bias collapsed into a single row-select matmul
        # (MXU friendly; avoids gather).  NOTE(v6e/v7x): a VPU broadcast-mul
        # -reduce row-select may beat a near-empty 256x256 MXU pass here;
        # keeping the MXU path as it is exact and simplest without a bundle
        # dump to compare against.
        onehot = (idx == vocab_iota).astype(jnp.float32)        # (B, V)
        logits = jnp.dot(onehot, mb,
                         preferred_element_type=jnp.float32)    # (B, V)

        # fused log_softmax, reusing the max needed for the argmax anyway
        m = jnp.max(logits, axis=-1, keepdims=True)             # (B, 1)
        lse = jnp.log(jnp.sum(jnp.exp(logits - m), axis=-1, keepdims=True))
        outs.append(logits - m - lse)                           # (B, V) in regs

        # greedy next token: argmax with first-occurrence tie-break (== topk(1))
        cand = jnp.where(logits == m, vocab_iota, V)
        idx = jnp.min(cand, axis=-1, keepdims=True).astype(jnp.int32)

    # one bulk store of the whole (B, T, V) result
    out_ref[...] = jnp.stack(outs, axis=1)


def decoder_rnn_forward(encoder_outputs, encoder_hidden, emb, w_out, b_out,
                        target_tensor=None):
    """Pallas equivalent of DecoderRNN.forward (greedy branch, target_tensor=None)."""
    # TODO(synk): teacher-forcing branch (target_tensor is not None) not wired
    # into the kernel; only greedy decoding is implemented.
    assert target_tensor is None
    B = encoder_outputs.shape[0]
    V, H = emb.shape

    # One-time algebraic hoist (exact):
    #   relu(onehot @ emb) @ W^T + b == onehot @ (relu(emb) @ W^T + b)
    # because one-hot selection commutes with elementwise relu and one-hot
    # rows sum to 1 (so the broadcast bias folds in).
    emb_f32 = jnp.asarray(emb).astype(jnp.float32)
    wT = jnp.asarray(w_out).T.astype(jnp.float32)               # (H, V)
    b = jnp.asarray(b_out).astype(jnp.float32)                  # (V,)
    mb = jnp.maximum(emb_f32, 0.0) @ wT + b[None, :]            # (V, V)

    decoder_outputs = pl.pallas_call(
        decoder_rnn_kernel,
        out_shape=jax.ShapeDtypeStruct((B, MAX_LENGTH, V), jnp.float32),
        in_specs=[pl.BlockSpec(memory_space=pltpu.MemorySpace.VMEM)],
        out_specs=pl.BlockSpec(memory_space=pltpu.MemorySpace.VMEM),
    )(mb)

    # decoder_hidden is returned unchanged (no GRU in this module)
    return decoder_outputs, encoder_hidden, None


def _reference_forward(emb, w_out, b_out, B):
    """Pure-JAX reference mirroring the PyTorch forward (greedy)."""
    idx = jnp.zeros((B,), dtype=jnp.int32)
    outs = []
    for _ in range(MAX_LENGTH):
        x = jnp.maximum(emb[idx], 0.0)                 # (B, H)
        logits = x @ w_out.T + b_out                   # (B, V)
        outs.append(logits)
        idx = jnp.argmax(logits, axis=-1).astype(jnp.int32)
    full = jnp.stack(outs, axis=1)                     # (B, T, V)
    return jax.nn.log_softmax(full, axis=-1)


if __name__ == "__main__":
    key = jax.random.PRNGKey(0)
    k_emb, k_w, k_b, k_enc, k_hid = jax.random.split(key, 5)

    batch = 2
    seq = 8
    hidden_size = 32
    output_size = 24   # vocab size

    # Deterministic parameter init (matches PyTorch init distributions in spirit)
    emb = jax.random.normal(k_emb, (output_size, hidden_size), dtype=jnp.float32)
    bound = 1.0 / np.sqrt(hidden_size)
    w_out = jax.random.uniform(k_w, (output_size, hidden_size),
                               minval=-bound, maxval=bound, dtype=jnp.float32)
    b_out = jax.random.uniform(k_b, (output_size,),
                               minval=-bound, maxval=bound, dtype=jnp.float32)

    # Example encoder outputs / hidden (hidden is just passed through)
    encoder_outputs = jax.random.normal(k_enc, (batch, seq, hidden_size),
                                        dtype=jnp.float32)
    encoder_hidden = jax.random.normal(k_hid, (1, batch, hidden_size),
                                       dtype=jnp.float32)

    dec_out, dec_hidden, attn = decoder_rnn_forward(
        encoder_outputs, encoder_hidden, emb, w_out, b_out)
    dec_out = jax.block_until_ready(dec_out)

    ref = _reference_forward(emb, w_out, b_out, batch)
    assert dec_out.shape == (batch, MAX_LENGTH, output_size)
    assert np.allclose(np.asarray(dec_out), np.asarray(ref), atol=1e-5, rtol=1e-5)
    assert np.allclose(np.asarray(dec_hidden), np.asarray(encoder_hidden))
    assert attn is None

    print("KERNEL_OK")
</pallas_src>

<mosaic_0001>
module attributes {stable_mosaic.version = 11 : i64} {
  func.func @decoder_rnn_kernel(%arg0: memref<24x24xf32, #tpu.memory_space<vmem>>, %arg1: memref<2x10x24xf32, #tpu.memory_space<vmem>>) attributes {dimension_semantics = [], scalar_prefetch = 0 : i64, scratch_operands = 0 : i64, tpu.core_type = #tpu.core_type<tc>} {
    %c0 = arith.constant 0 : index
    %c0_0 = arith.constant 0 : index
    %0 = vector.load %arg0[%c0, %c0_0] : memref<24x24xf32, #tpu.memory_space<vmem>>, vector<24x24xf32>
    %1 = tpu.iota {dimensions = array<i32: 1>} : vector<2x24xi32>
    %c0_i32 = arith.constant 0 : i32
    %2 = vector.broadcast %c0_i32 : i32 to vector<2x1xi32>
    %3 = vector.broadcast %2 : vector<2x1xi32> to vector<2x24xi32>
    %4 = arith.cmpi eq, %3, %1 : vector<2x24xi32>
    %5 = arith.extui %4 : vector<2x24xi1> to vector<2x24xi32>
    %6 = arith.sitofp %5 : vector<2x24xi32> to vector<2x24xf32>
    %cst = arith.constant dense<0.000000e+00> : vector<2x24xf32>
    %7 = tpu.matmul %6, %0, %cst {dimension_numbers = #tpu.dot_dimension_numbers<[1], [0], [0], [1], [0, 0, 1, 1], [], []>} : vector<2x24xf32>, vector<24x24xf32>, vector<2x24xf32> -> vector<2x24xf32>
    %cst_1 = arith.constant dense<0xFF800000> : vector<2xf32>
    %8 = vector.multi_reduction <maximumf>, %7, %cst_1 [1] : vector<2x24xf32> to vector<2xf32>
    %9 = vector.shape_cast %8 : vector<2xf32> to vector<2x1xf32>
    %10 = vector.broadcast %9 : vector<2x1xf32> to vector<2x24xf32>
    %11 = arith.subf %7, %10 : vector<2x24xf32>
    %12 = math.exp %11 : vector<2x24xf32>
    %cst_2 = arith.constant dense<0.000000e+00> : vector<2xf32>
    %13 = vector.multi_reduction <add>, %12, %cst_2 [1] : vector<2x24xf32> to vector<2xf32>
    %14 = vector.shape_cast %13 : vector<2xf32> to vector<2x1xf32>
    %15 = math.log %14 : vector<2x1xf32>
    %16 = vector.broadcast %9 : vector<2x1xf32> to vector<2x24xf32>
    %17 = arith.subf %7, %16 : vector<2x24xf32>
    %18 = vector.broadcast %15 : vector<2x1xf32> to vector<2x24xf32>
    %19 = arith.subf %17, %18 : vector<2x24xf32>
    %20 = vector.broadcast %9 : vector<2x1xf32> to vector<2x24xf32>
    %21 = arith.cmpf oeq, %7, %20 : vector<2x24xf32>
    %c24_i32 = arith.constant 24 : i32
    %22 = vector.broadcast %c24_i32 : i32 to vector<2x24xi32>
    %23 = arith.select %21, %1, %22 : vector<2x24xi1>, vector<2x24xi32>
    %cst_3 = arith.constant dense<2147483647> : vector<2xi32>
    %24 = vector.multi_reduction <minsi>, %23, %cst_3 [1] : vector<2x24xi32> to vector<2xi32>
    %25 = vector.shape_cast %24 : vector<2xi32> to vector<2x1xi32>
    %26 = vector.broadcast %25 : vector<2x1xi32> to vector<2x24xi32>
    %27 = arith.cmpi eq, %26, %1 : vector<2x24xi32>
    %28 = arith.extui %27 : vector<2x24xi1> to vector<2x24xi32>
    %29 = arith.sitofp %28 : vector<2x24xi32> to vector<2x24xf32>
    %cst_4 = arith.constant dense<0.000000e+00> : vector<2x24xf32>
    %30 = tpu.matmul %29, %0, %cst_4 {dimension_numbers = #tpu.dot_dimension_numbers<[1], [0], [0], [1], [0, 0, 1, 1], [], []>} : vector<2x24xf32>, vector<24x24xf32>, vector<2x24xf32> -> vector<2x24xf32>
    %cst_5 = arith.constant dense<0xFF800000> : vector<2xf32>
    %31 = vector.multi_reduction <maximumf>, %30, %cst_5 [1] : vector<2x24xf32> to vector<2xf32>
    %32 = vector.shape_cast %31 : vector<2xf32> to vector<2x1xf32>
    %33 = vector.broadcast %32 : vector<2x1xf32> to vector<2x24xf32>
    %34 = arith.subf %30, %33 : vector<2x24xf32>
    %35 = math.exp %34 : vector<2x24xf32>
    %cst_6 = arith.constant dense<0.000000e+00> : vector<2xf32>
    %36 = vector.multi_reduction <add>, %35, %cst_6 [1] : vector<2x24xf32> to vector<2xf32>
    %37 = vector.shape_cast %36 : vector<2xf32> to vector<2x1xf32>
    %38 = math.log %37 : vector<2x1xf32>
    %39 = vector.broadcast %32 : vector<2x1xf32> to vector<2x24xf32>
    %40 = arith.subf %30, %39 : vector<2x24xf32>
    %41 = vector.broadcast %38 : vector<2x1xf32> to vector<2x24xf32>
    %42 = arith.subf %40, %41 : vector<2x24xf32>
    %43 = vector.broadcast %32 : vector<2x1xf32> to vector<2x24xf32>
    %44 = arith.cmpf oeq, %30, %43 : vector<2x24xf32>
    %c24_i32_7 = arith.constant 24 : i32
    %45 = vector.broadcast %c24_i32_7 : i32 to vector<2x24xi32>
    %46 = arith.select %44, %1, %45 : vector<2x24xi1>, vector<2x24xi32>
    %cst_8 = arith.constant dense<2147483647> : vector<2xi32>
    %47 = vector.multi_reduction <minsi>, %46, %cst_8 [1] : vector<2x24xi32> to vector<2xi32>
    %48 = vector.shape_cast %47 : vector<2xi32> to vector<2x1xi32>
    %49 = vector.broadcast %48 : vector<2x1xi32> to vector<2x24xi32>
    %50 = arith.cmpi eq, %49, %1 : vector<2x24xi32>
    %51 = arith.extui %50 : vector<2x24xi1> to vector<2x24xi32>
    %52 = arith.sitofp %51 : vector<2x24xi32> to vector<2x24xf32>
    %cst_9 = arith.constant dense<0.000000e+00> : vector<2x24xf32>
    %53 = tpu.matmul %52, %0, %cst_9 {dimension_numbers = #tpu.dot_dimension_numbers<[1], [0], [0], [1], [0, 0, 1, 1], [], []>} : vector<2x24xf32>, vector<24x24xf32>, vector<2x24xf32> -> vector<2x24xf32>
    %cst_10 = arith.constant dense<0xFF800000> : vector<2xf32>
    %54 = vector.multi_reduction <maximumf>, %53, %cst_10 [1] : vector<2x24xf32> to vector<2xf32>
    %55 = vector.shape_cast %54 : vector<2xf32> to vector<2x1xf32>
    %56 = vector.broadcast %55 : vector<2x1xf32> to vector<2x24xf32>
    %57 = arith.subf %53, %56 : vector<2x24xf32>
    %58 = math.exp %57 : vector<2x24xf32>
    %cst_11 = arith.constant dense<0.000000e+00> : vector<2xf32>
    %59 = vector.multi_reduction <add>, %58, %cst_11 [1] : vector<2x24xf32> to vector<2xf32>
    %60 = vector.shape_cast %59 : vector<2xf32> to vector<2x1xf32>
    %61 = math.log %60 : vector<2x1xf32>
    %62 = vector.broadcast %55 : vector<2x1xf32> to vector<2x24xf32>
    %63 = arith.subf %53, %62 : vector<2x24xf32>
    %64 = vector.broadcast %61 : vector<2x1xf32> to vector<2x24xf32>
    %65 = arith.subf %63, %64 : vector<2x24xf32>
    %66 = vector.broadcast %55 : vector<2x1xf32> to vector<2x24xf32>
    %67 = arith.cmpf oeq, %53, %66 : vector<2x24xf32>
    %c24_i32_12 = arith.constant 24 : i32
    %68 = vector.broadcast %c24_i32_12 : i32 to vector<2x24xi32>
    %69 = arith.select %67, %1, %68 : vector<2x24xi1>, vector<2x24xi32>
    %cst_13 = arith.constant dense<2147483647> : vector<2xi32>
    %70 = vector.multi_reduction <minsi>, %69, %cst_13 [1] : vector<2x24xi32> to vector<2xi32>
    %71 = vector.shape_cast %70 : vector<2xi32> to vector<2x1xi32>
    %72 = vector.broadcast %71 : vector<2x1xi32> to vector<2x24xi32>
    %73 = arith.cmpi eq, %72, %1 : vector<2x24xi32>
    %74 = arith.extui %73 : vector<2x24xi1> to vector<2x24xi32>
    %75 = arith.sitofp %74 : vector<2x24xi32> to vector<2x24xf32>
    %cst_14 = arith.constant dense<0.000000e+00> : vector<2x24xf32>
    %76 = tpu.matmul %75, %0, %cst_14 {dimension_numbers = #tpu.dot_dimension_numbers<[1], [0], [0], [1], [0, 0, 1, 1], [], []>} : vector<2x24xf32>, vector<24x24xf32>, vector<2x24xf32> -> vector<2x24xf32>
    %cst_15 = arith.constant dense<0xFF800000> : vector<2xf32>
    %77 = vector.multi_reduction <maximumf>, %76, %cst_15 [1] : vector<2x24xf32> to vector<2xf32>
    %78 = vector.shape_cast %77 : vector<2xf32> to vector<2x1xf32>
    %79 = vector.broadcast %78 : vector<2x1xf32> to vector<2x24xf32>
    %80 = arith.subf %76, %79 : vector<2x24xf32>
    %81 = math.exp %80 : vector<2x24xf32>
    %cst_16 = arith.constant dense<0.000000e+00> : vector<2xf32>
    %82 = vector.multi_reduction <add>, %81, %cst_16 [1] : vector<2x24xf32> to vector<2xf32>
    %83 = vector.shape_cast %82 : vector<2xf32> to vector<2x1xf32>
    %84 = math.log %83 : vector<2x1xf32>
    %85 = vector.broadcast %78 : vector<2x1xf32> to vector<2x24xf32>
    %86 = arith.subf %76, %85 : vector<2x24xf32>
    %87 = vector.broadcast %84 : vector<2x1xf32> to vector<2x24xf32>
    %88 = arith.subf %86, %87 : vector<2x24xf32>
    %89 = vector.broadcast %78 : vector<2x1xf32> to vector<2x24xf32>
    %90 = arith.cmpf oeq, %76, %89 : vector<2x24xf32>
    %c24_i32_17 = arith.constant 24 : i32
    %91 = vector.broadcast %c24_i32_17 : i32 to vector<2x24xi32>
    %92 = arith.select %90, %1, %91 : vector<2x24xi1>, vector<2x24xi32>
    %cst_18 = arith.constant dense<2147483647> : vector<2xi32>
    %93 = vector.multi_reduction <minsi>, %92, %cst_18 [1] : vector<2x24xi32> to vector<2xi32>
    %94 = vector.shape_cast %93 : vector<2xi32> to vector<2x1xi32>
    %95 = vector.broadcast %94 : vector<2x1xi32> to vector<2x24xi32>
    %96 = arith.cmpi eq, %95, %1 : vector<2x24xi32>
    %97 = arith.extui %96 : vector<2x24xi1> to vector<2x24xi32>
    %98 = arith.sitofp %97 : vector<2x24xi32> to vector<2x24xf32>
    %cst_19 = arith.constant dense<0.000000e+00> : vector<2x24xf32>
    %99 = tpu.matmul %98, %0, %cst_19 {dimension_numbers = #tpu.dot_dimension_numbers<[1], [0], [0], [1], [0, 0, 1, 1], [], []>} : vector<2x24xf32>, vector<24x24xf32>, vector<2x24xf32> -> vector<2x24xf32>
    %cst_20 = arith.constant dense<0xFF800000> : vector<2xf32>
    %100 = vector.multi_reduction <maximumf>, %99, %cst_20 [1] : vector<2x24xf32> to vector<2xf32>
    %101 = vector.shape_cast %100 : vector<2xf32> to vector<2x1xf32>
    %102 = vector.broadcast %101 : vector<2x1xf32> to vector<2x24xf32>
    %103 = arith.subf %99, %102 : vector<2x24xf32>
    %104 = math.exp %103 : vector<2x24xf32>
    %cst_21 = arith.constant dense<0.000000e+00> : vector<2xf32>
    %105 = vector.multi_reduction <add>, %104, %cst_21 [1] : vector<2x24xf32> to vector<2xf32>
    %106 = vector.shape_cast %105 : vector<2xf32> to vector<2x1xf32>
    %107 = math.log %106 : vector<2x1xf32>
    %108 = vector.broadcast %101 : vector<2x1xf32> to vector<2x24xf32>
    %109 = arith.subf %99, %108 : vector<2x24xf32>
    %110 = vector.broadcast %107 : vector<2x1xf32> to vector<2x24xf32>
    %111 = arith.subf %109, %110 : vector<2x24xf32>
    %112 = vector.broadcast %101 : vector<2x1xf32> to vector<2x24xf32>
    %113 = arith.cmpf oeq, %99, %112 : vector<2x24xf32>
    %c24_i32_22 = arith.constant 24 : i32
    %114 = vector.broadcast %c24_i32_22 : i32 to vector<2x24xi32>
    %115 = arith.select %113, %1, %114 : vector<2x24xi1>, vector<2x24xi32>
    %cst_23 = arith.constant dense<2147483647> : vector<2xi32>
    %116 = vector.multi_reduction <minsi>, %115, %cst_23 [1] : vector<2x24xi32> to vector<2xi32>
    %117 = vector.shape_cast %116 : vector<2xi32> to vector<2x1xi32>
    %118 = vector.broadcast %117 : vector<2x1xi32> to vector<2x24xi32>
    %119 = arith.cmpi eq, %118, %1 : vector<2x24xi32>
    %120 = arith.extui %119 : vector<2x24xi1> to vector<2x24xi32>
    %121 = arith.sitofp %120 : vector<2x24xi32> to vector<2x24xf32>
    %cst_24 = arith.constant dense<0.000000e+00> : vector<2x24xf32>
    %122 = tpu.matmul %121, %0, %cst_24 {dimension_numbers = #tpu.dot_dimension_numbers<[1], [0], [0], [1], [0, 0, 1, 1], [], []>} : vector<2x24xf32>, vector<24x24xf32>, vector<2x24xf32> -> vector<2x24xf32>
    %cst_25 = arith.constant dense<0xFF800000> : vector<2xf32>
    %123 = vector.multi_reduction <maximumf>, %122, %cst_25 [1] : vector<2x24xf32> to vector<2xf32>
    %124 = vector.shape_cast %123 : vector<2xf32> to vector<2x1xf32>
    %125 = vector.broadcast %124 : vector<2x1xf32> to vector<2x24xf32>
    %126 = arith.subf %122, %125 : vector<2x24xf32>
    %127 = math.exp %126 : vector<2x24xf32>
    %cst_26 = arith.constant dense<0.000000e+00> : vector<2xf32>
    %128 = vector.multi_reduction <add>, %127, %cst_26 [1] : vector<2x24xf32> to vector<2xf32>
    %129 = vector.shape_cast %128 : vector<2xf32> to vector<2x1xf32>
    %130 = math.log %129 : vector<2x1xf32>
    %131 = vector.broadcast %124 : vector<2x1xf32> to vector<2x24xf32>
    %132 = arith.subf %122, %131 : vector<2x24xf32>
    %133 = vector.broadcast %130 : vector<2x1xf32> to vector<2x24xf32>
    %134 = arith.subf %132, %133 : vector<2x24xf32>
    %135 = vector.broadcast %124 : vector<2x1xf32> to vector<2x24xf32>
    %136 = arith.cmpf oeq, %122, %135 : vector<2x24xf32>
    %c24_i32_27 = arith.constant 24 : i32
    %137 = vector.broadcast %c24_i32_27 : i32 to vector<2x24xi32>
    %138 = arith.select %136, %1, %137 : vector<2x24xi1>, vector<2x24xi32>
    %cst_28 = arith.constant dense<2147483647> : vector<2xi32>
    %139 = vector.multi_reduction <minsi>, %138, %cst_28 [1] : vector<2x24xi32> to vector<2xi32>
    %140 = vector.shape_cast %139 : vector<2xi32> to vector<2x1xi32>
    %141 = vector.broadcast %140 : vector<2x1xi32> to vector<2x24xi32>
    %142 = arith.cmpi eq, %141, %1 : vector<2x24xi32>
    %143 = arith.extui %142 : vector<2x24xi1> to vector<2x24xi32>
    %144 = arith.sitofp %143 : vector<2x24xi32> to vector<2x24xf32>
    %cst_29 = arith.constant dense<0.000000e+00> : vector<2x24xf32>
    %145 = tpu.matmul %144, %0, %cst_29 {dimension_numbers = #tpu.dot_dimension_numbers<[1], [0], [0], [1], [0, 0, 1, 1], [], []>} : vector<2x24xf32>, vector<24x24xf32>, vector<2x24xf32> -> vector<2x24xf32>
    %cst_30 = arith.constant dense<0xFF800000> : vector<2xf32>
    %146 = vector.multi_reduction <maximumf>, %145, %cst_30 [1] : vector<2x24xf32> to vector<2xf32>
    %147 = vector.shape_cast %146 : vector<2xf32> to vector<2x1xf32>
    %148 = vector.broadcast %147 : vector<2x1xf32> to vector<2x24xf32>
    %149 = arith.subf %145, %148 : vector<2x24xf32>
    %150 = math.exp %149 : vector<2x24xf32>
    %cst_31 = arith.constant dense<0.000000e+00> : vector<2xf32>
    %151 = vector.multi_reduction <add>, %150, %cst_31 [1] : vector<2x24xf32> to vector<2xf32>
    %152 = vector.shape_cast %151 : vector<2xf32> to vector<2x1xf32>
    %153 = math.log %152 : vector<2x1xf32>
    %154 = vector.broadcast %147 : vector<2x1xf32> to vector<2x24xf32>
    %155 = arith.subf %145, %154 : vector<2x24xf32>
    %156 = vector.broadcast %153 : vector<2x1xf32> to vector<2x24xf32>
    %157 = arith.subf %155, %156 : vector<2x24xf32>
    %158 = vector.broadcast %147 : vector<2x1xf32> to vector<2x24xf32>
    %159 = arith.cmpf oeq, %145, %158 : vector<2x24xf32>
    %c24_i32_32 = arith.constant 24 : i32
    %160 = vector.broadcast %c24_i32_32 : i32 to vector<2x24xi32>
    %161 = arith.select %159, %1, %160 : vector<2x24xi1>, vector<2x24xi32>
    %cst_33 = arith.constant dense<2147483647> : vector<2xi32>
    %162 = vector.multi_reduction <minsi>, %161, %cst_33 [1] : vector<2x24xi32> to vector<2xi32>
    %163 = vector.shape_cast %162 : vector<2xi32> to vector<2x1xi32>
    %164 = vector.broadcast %163 : vector<2x1xi32> to vector<2x24xi32>
    %165 = arith.cmpi eq, %164, %1 : vector<2x24xi32>
    %166 = arith.extui %165 : vector<2x24xi1> to vector<2x24xi32>
    %167 = arith.sitofp %166 : vector<2x24xi32> to vector<2x24xf32>
    %cst_34 = arith.constant dense<0.000000e+00> : vector<2x24xf32>
    %168 = tpu.matmul %167, %0, %cst_34 {dimension_numbers = #tpu.dot_dimension_numbers<[1], [0], [0], [1], [0, 0, 1, 1], [], []>} : vector<2x24xf32>, vector<24x24xf32>, vector<2x24xf32> -> vector<2x24xf32>
    %cst_35 = arith.constant dense<0xFF800000> : vector<2xf32>
    %169 = vector.multi_reduction <maximumf>, %168, %cst_35 [1] : vector<2x24xf32> to vector<2xf32>
    %170 = vector.shape_cast %169 : vector<2xf32> to vector<2x1xf32>
    %171 = vector.broadcast %170 : vector<2x1xf32> to vector<2x24xf32>
    %172 = arith.subf %168, %171 : vector<2x24xf32>
    %173 = math.exp %172 : vector<2x24xf32>
    %cst_36 = arith.constant dense<0.000000e+00> : vector<2xf32>
    %174 = vector.multi_reduction <add>, %173, %cst_36 [1] : vector<2x24xf32> to vector<2xf32>
    %175 = vector.shape_cast %174 : vector<2xf32> to vector<2x1xf32>
    %176 = math.log %175 : vector<2x1xf32>
    %177 = vector.broadcast %170 : vector<2x1xf32> to vector<2x24xf32>
    %178 = arith.subf %168, %177 : vector<2x24xf32>
    %179 = vector.broadcast %176 : vector<2x1xf32> to vector<2x24xf32>
    %180 = arith.subf %178, %179 : vector<2x24xf32>
    %181 = vector.broadcast %170 : vector<2x1xf32> to vector<2x24xf32>
    %182 = arith.cmpf oeq, %168, %181 : vector<2x24xf32>
    %c24_i32_37 = arith.constant 24 : i32
    %183 = vector.broadcast %c24_i32_37 : i32 to vector<2x24xi32>
    %184 = arith.select %182, %1, %183 : vector<2x24xi1>, vector<2x24xi32>
    %cst_38 = arith.constant dense<2147483647> : vector<2xi32>
    %185 = vector.multi_reduction <minsi>, %184, %cst_38 [1] : vector<2x24xi32> to vector<2xi32>
    %186 = vector.shape_cast %185 : vector<2xi32> to vector<2x1xi32>
    %187 = vector.broadcast %186 : vector<2x1xi32> to vector<2x24xi32>
    %188 = arith.cmpi eq, %187, %1 : vector<2x24xi32>
    %189 = arith.extui %188 : vector<2x24xi1> to vector<2x24xi32>
    %190 = arith.sitofp %189 : vector<2x24xi32> to vector<2x24xf32>
    %cst_39 = arith.constant dense<0.000000e+00> : vector<2x24xf32>
    %191 = tpu.matmul %190, %0, %cst_39 {dimension_numbers = #tpu.dot_dimension_numbers<[1], [0], [0], [1], [0, 0, 1, 1], [], []>} : vector<2x24xf32>, vector<24x24xf32>, vector<2x24xf32> -> vector<2x24xf32>
    %cst_40 = arith.constant dense<0xFF800000> : vector<2xf32>
    %192 = vector.multi_reduction <maximumf>, %191, %cst_40 [1] : vector<2x24xf32> to vector<2xf32>
    %193 = vector.shape_cast %192 : vector<2xf32> to vector<2x1xf32>
    %194 = vector.broadcast %193 : vector<2x1xf32> to vector<2x24xf32>
    %195 = arith.subf %191, %194 : vector<2x24xf32>
    %196 = math.exp %195 : vector<2x24xf32>
    %cst_41 = arith.constant dense<0.000000e+00> : vector<2xf32>
    %197 = vector.multi_reduction <add>, %196, %cst_41 [1] : vector<2x24xf32> to vector<2xf32>
    %198 = vector.shape_cast %197 : vector<2xf32> to vector<2x1xf32>
    %199 = math.log %198 : vector<2x1xf32>
    %200 = vector.broadcast %193 : vector<2x1xf32> to vector<2x24xf32>
    %201 = arith.subf %191, %200 : vector<2x24xf32>
    %202 = vector.broadcast %199 : vector<2x1xf32> to vector<2x24xf32>
    %203 = arith.subf %201, %202 : vector<2x24xf32>
    %204 = vector.broadcast %193 : vector<2x1xf32> to vector<2x24xf32>
    %205 = arith.cmpf oeq, %191, %204 : vector<2x24xf32>
    %c24_i32_42 = arith.constant 24 : i32
    %206 = vector.broadcast %c24_i32_42 : i32 to vector<2x24xi32>
    %207 = arith.select %205, %1, %206 : vector<2x24xi1>, vector<2x24xi32>
    %cst_43 = arith.constant dense<2147483647> : vector<2xi32>
    %208 = vector.multi_reduction <minsi>, %207, %cst_43 [1] : vector<2x24xi32> to vector<2xi32>
    %209 = vector.shape_cast %208 : vector<2xi32> to vector<2x1xi32>
    %210 = vector.broadcast %209 : vector<2x1xi32> to vector<2x24xi32>
    %211 = arith.cmpi eq, %210, %1 : vector<2x24xi32>
    %212 = arith.extui %211 : vector<2x24xi1> to vector<2x24xi32>
    %213 = arith.sitofp %212 : vector<2x24xi32> to vector<2x24xf32>
    %cst_44 = arith.constant dense<0.000000e+00> : vector<2x24xf32>
    %214 = tpu.matmul %213, %0, %cst_44 {dimension_numbers = #tpu.dot_dimension_numbers<[1], [0], [0], [1], [0, 0, 1, 1], [], []>} : vector<2x24xf32>, vector<24x24xf32>, vector<2x24xf32> -> vector<2x24xf32>
    %cst_45 = arith.constant dense<0xFF800000> : vector<2xf32>
    %215 = vector.multi_reduction <maximumf>, %214, %cst_45 [1] : vector<2x24xf32> to vector<2xf32>
    %216 = vector.shape_cast %215 : vector<2xf32> to vector<2x1xf32>
    %217 = vector.broadcast %216 : vector<2x1xf32> to vector<2x24xf32>
    %218 = arith.subf %214, %217 : vector<2x24xf32>
    %219 = math.exp %218 : vector<2x24xf32>
    %cst_46 = arith.constant dense<0.000000e+00> : vector<2xf32>
    %220 = vector.multi_reduction <add>, %219, %cst_46 [1] : vector<2x24xf32> to vector<2xf32>
    %221 = vector.shape_cast %220 : vector<2xf32> to vector<2x1xf32>
    %222 = math.log %221 : vector<2x1xf32>
    %223 = vector.broadcast %216 : vector<2x1xf32> to vector<2x24xf32>
    %224 = arith.subf %214, %223 : vector<2x24xf32>
    %225 = vector.broadcast %222 : vector<2x1xf32> to vector<2x24xf32>
    %226 = arith.subf %224, %225 : vector<2x24xf32>
    %227 = vector.shape_cast %19 : vector<2x24xf32> to vector<2x1x24xf32>
    %228 = vector.shape_cast %42 : vector<2x24xf32> to vector<2x1x24xf32>
    %229 = vector.shape_cast %65 : vector<2x24xf32> to vector<2x1x24xf32>
    %230 = vector.shape_cast %88 : vector<2x24xf32> to vector<2x1x24xf32>
    %231 = vector.shape_cast %111 : vector<2x24xf32> to vector<2x1x24xf32>
    %232 = vector.shape_cast %134 : vector<2x24xf32> to vector<2x1x24xf32>
    %233 = vector.shape_cast %157 : vector<2x24xf32> to vector<2x1x24xf32>
    %234 = vector.shape_cast %180 : vector<2x24xf32> to vector<2x1x24xf32>
    %235 = vector.shape_cast %203 : vector<2x24xf32> to vector<2x1x24xf32>
    %236 = vector.shape_cast %226 : vector<2x24xf32> to vector<2x1x24xf32>
    %237 = tpu.concatenate %227, %228, %229, %230, %231, %232, %233, %234, %235, %236 in 1 : vector<2x1x24xf32>, vector<2x1x24xf32>, vector<2x1x24xf32>, vector<2x1x24xf32>, vector<2x1x24xf32>, vector<2x1x24xf32>, vector<2x1x24xf32>, vector<2x1x24xf32>, vector<2x1x24xf32>, vector<2x1x24xf32> -> vector<2x10x24xf32>
    %c0_47 = arith.constant 0 : index
    %c0_48 = arith.constant 0 : index
    %c0_49 = arith.constant 0 : index
    %238 = vector.load %arg1[%c0_47, %c0_48, %c0_49] : memref<2x10x24xf32, #tpu.memory_space<vmem>>, vector<2x10x24xf32>
    tpu.vector_store %arg1[%c0_47, %c0_48, %c0_49], %237 {strides = array<i32>} : memref<2x10x24xf32, #tpu.memory_space<vmem>>, vector<2x10x24xf32>,
    return
  }
}

</mosaic_0001>

<bundles_post_ra>
// kernel: tpu_custom_call.1
= control target key start
LH: loop header
LB: loop body
LE: loop exit
PB: predicated region body
PF: predicated region fallthrough
CT: control target
= control target key end

     0   :  { %6 = vsyncpa [#allocation3], 0  ;;  %s1659_s6 = smov [#allocation2]   ;;  %s2014_s0 = inlined_call_operand.hbm [shape: f32[24,24], index: 0, kind: input, shape index: {}]   ;;  %s2015_s1 = inlined_call_operand.vmem [shape: f32[2,10,24], index: 1, kind: output, shape index: {}]  }
   0x1   :  { %s12_s7 = sshll.u32 %s1659_s6, 4  ;;  %s1635_s10 = scalar_lea.hbm %s2014_s0, 384  ;;  %s13_s7 = int_to_ptr.vmem [resolvable:$true] %s12_s7 }
   0x2   :  { %p1636_p0 = scmp.ne.s32.totalorder %s2014_s0, %s1635_s10  ;;  %p1639_p1 = scmp.lt.u32.totalorder %s1635_s10, %s2014_s0 }
   0x4   :  { %p1641_p2 = pnand %p1639_p1, %p1636_p0 }
   0x6   :  { %1644 = shalt.err (!%p1641_p2)
}
   0x7   :  { %s1645_s15 = scalar_lea.vmem %s13_s7, 384  ;;  %p1650_p4 = scmp.lt.s32.totalorder %s13_s7, %s13_s7 }
   0x8   :  { %p1646_p3 = scmp.ne.s32.totalorder %s13_s7, %s1645_s15  ;;  %p1651_p5 = scmp.lt.s32.totalorder %s1645_s15, %s1645_s15 }
   0xa   :  { %p1652_p6 = por %p1651_p5, %p1650_p4 }
   0xc   :  { %p1653_p7 = pnand %p1652_p6, %p1646_p3 }
   0xe   :  { %1656 = shalt.err (!%p1653_p7)
}
   0xf   :  { %s1660_s16 = smov 128   ;;  %s1661_s17 = smov 8  }
  0x10   :  { %18 = dma.hbm_to_vmem [thread:$0]  %s2014_s0, 384, %s13_s7, [#allocation3], %s1660_s16, %s1660_s16, %s1661_s17  }
  0x11   :  { %1657 = dma.done.wait [#allocation3], 384  }
  0x12   :  { %1658 = vsyncadd [#allocation3], 4294966912  ;;  %v1662_v0 = vmov 0.0|0.0   ;;  %vm1663_vm0 = vmmov 0   ;;  %v1664_v1 = vmov 0.0   ;;  %v25_v2 = vlaneseq  ;;  %v22_v4 = vld [vmem:[#allocation2] sm:$0xff] }
  0x13   :  { %1558 = vmatprep.subr.bf16.mxu0 %v1662_v0  ;;  %1474 = vmatprep.mubr.msk.f32.mxu0 %vm1663_vm0, %v1664_v1  ;;  %v23_v5 = vld [vmem:[#allocation2 + $0x8] sm:$0xff]  ;;  %v1703_v7 = vld [vmem:[#allocation2 + $0x10] sm:$0xff]  ;;  %vm30_vm2 = vcmask 195584   ;;  %vm104_vm3 = vcmask 189440  }
  0x14   :  { %1561 = vmatprep.subr.bf16.mxu1 %v1662_v0  ;;  %1483 = vmatprep.mubr.msk.f32.mxu1 %vm1663_vm0, %v1664_v1  ;;  %v1695_v3 = vand.u32 127, %v25_v2  ;;  %v1697_v6 = vpack.c.bf16 %v23_v5, %v22_v4 }
  0x16   :  { %vm27_vm1 = vcmp.eq.s32.totalorder %v1695_v3, 0  ;;  %1560 = vmatpush3.bf16.msra.mxu0 %v1697_v6  ;;  %1563 = vmatpush3.bf16.msra.mxu1 %v1697_v6 }
  0x17   :  { %1472 = vmatprep.subr.mxu0 %v1664_v1  ;;  %1481 = vmatprep.subr.mxu1 %v1664_v1  ;;  %v1408_v8 = vsel %vm27_vm1, 1.0, %v1664_v1 }
  0x1a   :  { %1473 = vmatpush3.msra.mxu0 %v1703_v7  ;;  %1482 = vmatpush3.msra.mxu1 %v1703_v7 }
  0x1b   :  { %1475 = vmatmul.mubr.msk.f32.vlgmr.msra.gmra.mrb[0].mxu0 %vm30_vm2, %v1408_v8  ;;  %1564 = vmatprep.subr.bf16.mxu0 %v1662_v0 }
  0x1c   :  { %1566 = vmatpush3.bf16.msra.mxu0 %v1697_v6  ;;  %1492 = vmatprep.mubr.msk.f32.mxu0 %vm1663_vm0, %v1664_v1 }
  0x1d   :  { %1490 = vmatprep.subr.mxu0 %v1664_v1  ;;  %1567 = vmatprep.subr.bf16.mxu1 %v1662_v0 }
  0x20   :  { %1491 = vmatpush3.msra.mxu0 %v1703_v7 }
  0x21   :  { %1570 = vmatprep.subr.bf16.mxu0 %v1662_v0 }
  0xee   :  { %v1718_v9 = vpop.f32.mrb[0].mxu0 }
  0xef   :  { %v1476_v10 = vpop.f32.mrb[1].mxu0  ;;  %v105_v11 = vsel %vm104_vm3, %v1718_v9, -inf }
  0xf0   :  { %106 = vmax.xlane.f32.xlu0 %v105_v11 }
 0x17d   :  { %v1722_v12 = vpop.xlane.xlu0 %106 }
 0x17e   :  { %vm117_vm4 = vcmp.eq.f32.partialorder %v1718_v9, %v1722_v12 }
 0x17f   :  { %v118_v13 = vsel %vm117_vm4, %v1695_v3, 24 }
 0x180   :  { %v119_v14 = vsel %vm104_vm3, %v118_v13, 2147483647 }
 0x181   :  { %v121_v15 = vshra.s32 %v119_v14, 16  ;;  %v120_v17 = vand.u32 65535, %v119_v14 }
 0x183   :  { %v123_v16 = vcvt.s32.f32 %v121_v15  ;;  %v122_v19 = vcvt.s32.f32 %v120_v17 }
 0x185   :  { %124 = vmin.xlane.f32.xlu0 %v123_v16 }
 0x212   :  { %v125_v18 = vpop.xlane.xlu0 %124 }
 0x213   :  { %vm126_vm5 = vcmp.eq.f32.partialorder %v123_v16, %v125_v18  ;;  %v131_v21 = vcvt.f32.s32 %v125_v18 }
 0x214   :  { %v127_v20 = vsel %vm126_vm5, %v122_v19, inf }
 0x215   :  { %128 = vmin.xlane.f32.xlu1 %v127_v20  ;;  %v132_v23 = vshll.u32 %v131_v21, 16 }
 0x2a2   :  { %v129_v22 = vpop.xlane.xlu1 %128 }
 0x2a3   :  { %v130_v24 = vcvt.f32.s32 %v129_v22 }
 0x2a5   :  { %v133_v25 = vadd.s32 %v132_v23, %v130_v24 }
 0x2a7   :  { %vm134_vm6 = vcmp.eq.s32.totalorder %v133_v25, %v1695_v3 }
 0x2a8   :  { %v1410_v26 = vsel %vm134_vm6, 1.0, %v1664_v1 }
 0x2a9   :  { %1484 = vmatmul.mubr.msk.f32.vlgmr.msra.gmra.mrb[0].mxu1 %vm30_vm2, %v1410_v26 }
 0x2aa   :  { %1569 = vmatpush3.bf16.msra.mxu1 %v1697_v6  ;;  %1501 = vmatprep.mubr.msk.f32.mxu1 %vm1663_vm0, %v1664_v1 }
 0x2ab   :  { %1499 = vmatprep.subr.mxu1 %v1664_v1 }
 0x2ae   :  { %1500 = vmatpush3.msra.mxu1 %v1703_v7 }
 0x2af   :  { %1573 = vmatprep.subr.bf16.mxu1 %v1662_v0 }
 0x37c   :  { %v1737_v27 = vpop.f32.mrb[0].mxu1 }
 0x37d   :  { %v1485_v28 = vpop.f32.mrb[1].mxu1  ;;  %v210_v29 = vsel %vm104_vm3, %v1737_v27, -inf }
 0x37e   :  { %211 = vmax.xlane.f32.xlu1 %v210_v29 }
 0x40b   :  { %v1741_v30 = vpop.xlane.xlu1 %211 }
 0x40c   :  { %vm222_vm7 = vcmp.eq.f32.partialorder %v1737_v27, %v1741_v30 }
 0x40d   :  { %v223_v31 = vsel %vm222_vm7, %v1695_v3, 24 }
 0x40e   :  { %v224_v32 = vsel %vm104_vm3, %v223_v31, 2147483647 }
 0x40f   :  { %v226_v33 = vshra.s32 %v224_v32, 16  ;;  %v225_v35 = vand.u32 65535, %v224_v32 }
 0x411   :  { %v228_v34 = vcvt.s32.f32 %v226_v33  ;;  %v227_v37 = vcvt.s32.f32 %v225_v35 }
 0x413   :  { %229 = vmin.xlane.f32.xlu0 %v228_v34 }
 0x4a0   :  { %v230_v36 = vpop.xlane.xlu0 %229 }
 0x4a1   :  { %vm231_vm8 = vcmp.eq.f32.partialorder %v228_v34, %v230_v36  ;;  %v236_v39 = vcvt.f32.s32 %v230_v36 }
 0x4a2   :  { %v232_v38 = vsel %vm231_vm8, %v227_v37, inf }
 0x4a3   :  { %233 = vmin.xlane.f32.xlu1 %v232_v38  ;;  %v237_v41 = vshll.u32 %v236_v39, 16 }
 0x530   :  { %v234_v40 = vpop.xlane.xlu1 %233 }
 0x531   :  { %v235_v42 = vcvt.f32.s32 %v234_v40 }
 0x533   :  { %v238_v43 = vadd.s32 %v237_v41, %v235_v42 }
 0x535   :  { %vm239_vm9 = vcmp.eq.s32.totalorder %v238_v43, %v1695_v3 }
 0x536   :  { %v1412_v44 = vsel %vm239_vm9, 1.0, %v1664_v1 }
 0x537   :  { %1493 = vmatmul.mubr.msk.f32.vlgmr.msra.gmra.mrb[2].mxu0 %vm30_vm2, %v1412_v44 }
 0x538   :  { %1572 = vmatpush3.bf16.msra.mxu0 %v1697_v6  ;;  %1510 = vmatprep.mubr.msk.f32.mxu0 %vm1663_vm0, %v1664_v1 }
 0x539   :  { %1508 = vmatprep.subr.mxu0 %v1664_v1 }
 0x53c   :  { %1509 = vmatpush3.msra.mxu0 %v1703_v7 }
 0x53d   :  { %1576 = vmatprep.subr.bf16.mxu0 %v1662_v0 }
 0x60a   :  { %v1756_v45 = vpop.f32.mrb[2].mxu0 }
 0x60b   :  { %v1494_v46 = vpop.f32.mrb[3].mxu0  ;;  %v315_v47 = vsel %vm104_vm3, %v1756_v45, -inf }
 0x60c   :  { %316 = vmax.xlane.f32.xlu0 %v315_v47 }
 0x699   :  { %v1760_v48 = vpop.xlane.xlu0 %316 }
 0x69a   :  { %vm327_vm10 = vcmp.eq.f32.partialorder %v1756_v45, %v1760_v48 }
 0x69b   :  { %v328_v49 = vsel %vm327_vm10, %v1695_v3, 24 }
 0x69c   :  { %v329_v50 = vsel %vm104_vm3, %v328_v49, 2147483647 }
 0x69d   :  { %v331_v51 = vshra.s32 %v329_v50, 16  ;;  %v330_v53 = vand.u32 65535, %v329_v50 }
 0x69f   :  { %v333_v52 = vcvt.s32.f32 %v331_v51  ;;  %v332_v55 = vcvt.s32.f32 %v330_v53 }
 0x6a1   :  { %334 = vmin.xlane.f32.xlu1 %v333_v52 }
 0x72e   :  { %v335_v54 = vpop.xlane.xlu1 %334 }
 0x72f   :  { %vm336_vm11 = vcmp.eq.f32.partialorder %v333_v52, %v335_v54  ;;  %v341_v57 = vcvt.f32.s32 %v335_v54 }
 0x730   :  { %v337_v56 = vsel %vm336_vm11, %v332_v55, inf }
 0x731   :  { %338 = vmin.xlane.f32.xlu0 %v337_v56  ;;  %v342_v59 = vshll.u32 %v341_v57, 16 }
 0x7be   :  { %v339_v58 = vpop.xlane.xlu0 %338 }
 0x7bf   :  { %v340_v60 = vcvt.f32.s32 %v339_v58 }
 0x7c1   :  { %v343_v61 = vadd.s32 %v342_v59, %v340_v60 }
 0x7c3   :  { %vm344_vm12 = vcmp.eq.s32.totalorder %v343_v61, %v1695_v3 }
 0x7c4   :  { %v1414_v62 = vsel %vm344_vm12, 1.0, %v1664_v1 }
 0x7c5   :  { %1502 = vmatmul.mubr.msk.f32.vlgmr.msra.gmra.mrb[2].mxu1 %vm30_vm2, %v1414_v62 }
 0x7c6   :  { %1575 = vmatpush3.bf16.msra.mxu1 %v1697_v6  ;;  %1519 = vmatprep.mubr.msk.f32.mxu1 %vm1663_vm0, %v1664_v1 }
 0x7c7   :  { %1517 = vmatprep.subr.mxu1 %v1664_v1 }
 0x7ca   :  { %1518 = vmatpush3.msra.mxu1 %v1703_v7 }
 0x7cb   :  { %1579 = vmatprep.subr.bf16.mxu1 %v1662_v0 }
 0x898   :  { %v1775_v63 = vpop.f32.mrb[2].mxu1 }
 0x899   :  { %v1503_v4 = vpop.f32.mrb[3].mxu1  ;;  %v420_v5 = vsel %vm104_vm3, %v1775_v63, -inf }
 0x89a   :  { %421 = vmax.xlane.f32.xlu1 %v420_v5 }
 0x927   :  { %v1779_v8 = vpop.xlane.xlu1 %421 }
 0x928   :  { %vm432_vm13 = vcmp.eq.f32.partialorder %v1775_v63, %v1779_v8 }
 0x929   :  { %v433_v10 = vsel %vm432_vm13, %v1695_v3, 24 }
 0x92a   :  { %v434_v11 = vsel %vm104_vm3, %v433_v10, 2147483647 }
 0x92b   :  { %v436_v13 = vshra.s32 %v434_v11, 16  ;;  %v435_v15 = vand.u32 65535, %v434_v11 }
 0x92d   :  { %v438_v14 = vcvt.s32.f32 %v436_v13  ;;  %v437_v17 = vcvt.s32.f32 %v435_v15 }
 0x92f   :  { %439 = vmin.xlane.f32.xlu0 %v438_v14 }
 0x9bc   :  { %v440_v16 = vpop.xlane.xlu0 %439 }
 0x9bd   :  { %vm441_vm14 = vcmp.eq.f32.partialorder %v438_v14, %v440_v16  ;;  %v446_v19 = vcvt.f32.s32 %v440_v16 }
 0x9be   :  { %v442_v18 = vsel %vm441_vm14, %v437_v17, inf }
 0x9bf   :  { %443 = vmin.xlane.f32.xlu1 %v442_v18  ;;  %v447_v21 = vshll.u32 %v446_v19, 16 }
 0xa4c   :  { %v444_v20 = vpop.xlane.xlu1 %443 }
 0xa4d   :  { %v445_v22 = vcvt.f32.s32 %v444_v20 }
 0xa4f   :  { %v448_v23 = vadd.s32 %v447_v21, %v445_v22 }
 0xa51   :  { %vm449_vm15 = vcmp.eq.s32.totalorder %v448_v23, %v1695_v3 }
 0xa52   :  { %v1416_v24 = vsel %vm449_vm15, 1.0, %v1664_v1 }
 0xa53   :  { %1511 = vmatmul.mubr.msk.f32.vlgmr.msra.gmra.mrb[4].mxu0 %vm30_vm2, %v1416_v24 }
 0xa54   :  { %1578 = vmatpush3.bf16.msra.mxu0 %v1697_v6  ;;  %1528 = vmatprep.mubr.msk.f32.mxu0 %vm1663_vm0, %v1664_v1 }
 0xa55   :  { %1526 = vmatprep.subr.mxu0 %v1664_v1 }
 0xa58   :  { %1527 = vmatpush3.msra.mxu0 %v1703_v7 }
 0xa59   :  { %1582 = vmatprep.subr.bf16.mxu0 %v1662_v0 }
 0xb26   :  { %v1794_v25 = vpop.f32.mrb[4].mxu0 }
 0xb27   :  { %v1512_v26 = vpop.f32.mrb[5].mxu0  ;;  %v525_v28 = vsel %vm104_vm3, %v1794_v25, -inf }
 0xb28   :  { %526 = vmax.xlane.f32.xlu0 %v525_v28 }
 0xbb5   :  { %v1798_v29 = vpop.xlane.xlu0 %526 }
 0xbb6   :  { %vm537_vm1 = vcmp.eq.f32.partialorder %v1794_v25, %v1798_v29 }
 0xbb7   :  { %v538_v31 = vsel %vm537_vm1, %v1695_v3, 24 }
 0xbb8   :  { %v539_v32 = vsel %vm104_vm3, %v538_v31, 2147483647 }
 0xbb9   :  { %v541_v33 = vshra.s32 %v539_v32, 16  ;;  %v540_v35 = vand.u32 65535, %v539_v32 }
 0xbbb   :  { %v543_v34 = vcvt.s32.f32 %v541_v33  ;;  %v542_v37 = vcvt.s32.f32 %v540_v35 }
 0xbbd   :  { %544 = vmin.xlane.f32.xlu1 %v543_v34 }
 0xc4a   :  { %v545_v36 = vpop.xlane.xlu1 %544 }
 0xc4b   :  { %vm546_vm4 = vcmp.eq.f32.partialorder %v543_v34, %v545_v36  ;;  %v551_v39 = vcvt.f32.s32 %v545_v36 }
 0xc4c   :  { %v547_v38 = vsel %vm546_vm4, %v542_v37, inf  ;;  %vm1376_vm4 = vcmask 1040384  }
 0xc4d   :  { %548 = vmin.xlane.f32.xlu0 %v547_v38  ;;  %v552_v41 = vshll.u32 %v551_v39, 16 }
 0xcda   :  { %v549_v40 = vpop.xlane.xlu0 %548 }
 0xcdb   :  { %v550_v42 = vcvt.f32.s32 %v549_v40 }
 0xcdd   :  { %v553_v43 = vadd.s32 %v552_v41, %v550_v42 }
 0xcdf   :  { %vm554_vm5 = vcmp.eq.s32.totalorder %v553_v43, %v1695_v3 }
 0xce0   :  { %v1418_v44 = vsel %vm554_vm5, 1.0, %v1664_v1  ;;  %vm1379_vm5 = vcmask 1041408  }
 0xce1   :  { %1520 = vmatmul.mubr.msk.f32.vlgmr.msra.gmra.mrb[4].mxu1 %vm30_vm2, %v1418_v44 }
 0xce2   :  { %1581 = vmatpush3.bf16.msra.mxu1 %v1697_v6  ;;  %1537 = vmatprep.mubr.msk.f32.mxu1 %vm1663_vm0, %v1664_v1 }
 0xce3   :  { %1535 = vmatprep.subr.mxu1 %v1664_v1 }
 0xce6   :  { %1536 = vmatpush3.msra.mxu1 %v1703_v7 }
 0xce7   :  { %1585 = vmatprep.subr.bf16.mxu1 %v1662_v0 }
 0xdb4   :  { %v1813_v46 = vpop.f32.mrb[4].mxu1 }
 0xdb5   :  { %v1521_v47 = vpop.f32.mrb[5].mxu1  ;;  %v630_v49 = vsel %vm104_vm3, %v1813_v46, -inf }
 0xdb6   :  { %631 = vmax.xlane.f32.xlu1 %v630_v49 }
 0xe43   :  { %v1817_v50 = vpop.xlane.xlu1 %631 }
 0xe44   :  { %vm642_vm6 = vcmp.eq.f32.partialorder %v1813_v46, %v1817_v50 }
 0xe45   :  { %v643_v51 = vsel %vm642_vm6, %v1695_v3, 24  ;;  %vm1382_vm6 = vcmask 1042432  }
 0xe46   :  { %v644_v52 = vsel %vm104_vm3, %v643_v51, 2147483647 }
 0xe47   :  { %v646_v53 = vshra.s32 %v644_v52, 16  ;;  %v645_v0 = vand.u32 65535, %v644_v52 }
 0xe49   :  { %v648_v54 = vcvt.s32.f32 %v646_v53  ;;  %v647_v56 = vcvt.s32.f32 %v645_v0 }
 0xe4b   :  { %649 = vmin.xlane.f32.xlu0 %v648_v54 }
 0xed8   :  { %v650_v55 = vpop.xlane.xlu0 %649 }
 0xed9   :  { %vm651_vm7 = vcmp.eq.f32.partialorder %v648_v54, %v650_v55  ;;  %v656_v58 = vcvt.f32.s32 %v650_v55 }
 0xeda   :  { %v652_v57 = vsel %vm651_vm7, %v647_v56, inf  ;;  %vm1385_vm7 = vcmask 1043456  }
 0xedb   :  { %653 = vmin.xlane.f32.xlu1 %v652_v57  ;;  %v657_v60 = vshll.u32 %v656_v58, 16 }
 0xf68   :  { %v654_v59 = vpop.xlane.xlu1 %653 }
 0xf69   :  { %v655_v61 = vcvt.f32.s32 %v654_v59  ;;  %v1867_v59 = vsub.f32 %v1737_v27, %v1741_v30 }
 0xf6b   :  { %v658_v62 = vadd.s32 %v657_v60, %v655_v61  ;;  %v1871_v60 = vsub.f32 %v1718_v9, %v1722_v12  ;;  %v214_v61 = vmul.f32 1.442695, %v1867_v59 }
 0xf6d   :  { %vm659_vm8 = vcmp.eq.s32.totalorder %v658_v62, %v1695_v3  ;;  %v109_v62 = vmul.f32 1.442695, %v1871_v60  ;;  %1595 = vpow2.f32 %v214_v61 }
 0xf6e   :  { %v1420_v4 = vsel %vm659_vm8, 1.0, %v1664_v1  ;;  %vm1388_vm8 = vcmask 1044480  }
 0xf6f   :  { %1529 = vmatmul.mubr.msk.f32.vlgmr.msra.gmra.mrb[6].mxu0 %vm30_vm2, %v1420_v4  ;;  %v1877_v4 = vsub.f32 %v1794_v25, %v1798_v29  ;;  %1597 = vpow2.f32 %v109_v62 }
 0xf70   :  { %1584 = vmatpush3.bf16.msra.mxu0 %v1697_v6  ;;  %1546 = vmatprep.mubr.msk.f32.mxu0 %vm1663_vm0, %v1664_v1 }
 0xf71   :  { %1544 = vmatprep.subr.mxu0 %v1664_v1 }
 0xf74   :  { %1545 = vmatpush3.msra.mxu0 %v1703_v7 }
0x1042   :  { %v1831_v5 = vpop.f32.mrb[6].mxu0 }
0x1043   :  { %v1530_v10 = vpop.f32.mrb[7].mxu0  ;;  %v735_v11 = vsel %vm104_vm3, %v1831_v5, -inf }
0x1044   :  { %736 = vmax.xlane.f32.xlu0 %v735_v11  ;;  %v529_v11 = vmul.f32 1.442695, %v1877_v4 }
0x1046   :  { %1599 = vpow2.f32 %v529_v11 }
0x10d1   :  { %v1835_v13 = vpop.xlane.xlu0 %736 }
0x10d2   :  { %vm747_vm9 = vcmp.eq.f32.partialorder %v1831_v5, %v1835_v13  ;;  %v1882_v27 = vsub.f32 %v1831_v5, %v1835_v13 }
0x10d3   :  { %v748_v14 = vsel %vm747_vm9, %v1695_v3, 24  ;;  %vm1391_vm9 = vcmask 1045504  }
0x10d4   :  { %v749_v15 = vsel %vm104_vm3, %v748_v14, 2147483647  ;;  %v739_v12 = vmul.f32 1.442695, %v1882_v27 }
0x10d5   :  { %v751_v16 = vshra.s32 %v749_v15, 16  ;;  %v750_v18 = vand.u32 65535, %v749_v15  ;;  %v1596_v15 = vpop.eup %1595 }
0x10d6   :  { %1601 = vpow2.f32 %v739_v12  ;;  %v216_v25 = vsel %vm104_vm3, %v1596_v15, 0.0  ;;  %v1598_v29 = vpop.eup %1597 }
0x10d7   :  { %v753_v17 = vcvt.s32.f32 %v751_v16  ;;  %v752_v20 = vcvt.s32.f32 %v750_v18  ;;  %v111_v16 = vsel %vm104_vm3, %v1598_v29, 0.0 }
0x10d9   :  { %754 = vmin.xlane.f32.xlu1 %v753_v17 }
0x1166   :  { %v755_v19 = vpop.xlane.xlu1 %754 }
0x1167   :  { %vm756_vm10 = vcmp.eq.f32.partialorder %v753_v17, %v755_v19  ;;  %v761_v22 = vcvt.f32.s32 %v755_v19  ;;  %v1600_v17 = vpop.eup %1599 }
0x1168   :  { %v757_v21 = vsel %vm756_vm10, %v752_v20, inf  ;;  %v531_v5 = vsel %vm104_vm3, %v1600_v17, 0.0  ;;  %v1602_v13 = vpop.eup %1601  ;;  %vm1394_vm10 = vcmask 1046528  }
0x1169   :  { %758 = vmin.xlane.f32.xlu0 %v757_v21  ;;  %v762_v24 = vshll.u32 %v761_v22, 16  ;;  %v741_v18 = vsel %vm104_vm3, %v1602_v13, 0.0 }
0x11f6   :  { %v759_v23 = vpop.xlane.xlu0 %758 }
0x11f7   :  { %v760_v26 = vcvt.f32.s32 %v759_v23 }
0x11f9   :  { %v763_v28 = vadd.s32 %v762_v24, %v760_v26  ;;  %v1894_v26 = vsub.f32 %v1756_v45, %v1760_v48 }
0x11fb   :  { %vm764_vm11 = vcmp.eq.s32.totalorder %v763_v28, %v1695_v3  ;;  %v319_v28 = vmul.f32 1.442695, %v1894_v26 }
0x11fc   :  { %v1422_v31 = vsel %vm764_vm11, 1.0, %v1664_v1 }
0x11fd   :  { %1538 = vmatmul.mubr.msk.f32.vlgmr.msra.gmra.mrb[6].mxu1 %vm30_vm2, %v1422_v31  ;;  %v1899_v31 = vsub.f32 %v1775_v63, %v1779_v8  ;;  %1603 = vpow2.f32 %v319_v28 }
0x11fe   :  { %1587 = vmatpush3.bf16.msra.mxu1 %v1697_v6  ;;  %1555 = vmatprep.mubr.msk.f32.mxu1 %vm1663_vm0, %v1664_v1 }
0x11ff   :  { %1553 = vmatprep.subr.mxu1 %v1664_v1 }
0x1202   :  { %1554 = vmatpush3.msra.mxu1 %v1703_v7 }
0x12d0   :  { %v1849_v32 = vpop.f32.mrb[6].mxu1 }
0x12d1   :  { %v1539_v33 = vpop.f32.mrb[7].mxu1  ;;  %v840_v34 = vsel %vm104_vm3, %v1849_v32, -inf }
0x12d2   :  { %841 = vmax.xlane.f32.xlu1 %v840_v34  ;;  %v424_v33 = vmul.f32 1.442695, %v1899_v31 }
0x12d4   :  { %1605 = vpow2.f32 %v424_v33 }
0x135f   :  { %v1853_v35 = vpop.xlane.xlu1 %841 }
0x1360   :  { %vm852_vm12 = vcmp.eq.f32.partialorder %v1849_v32, %v1853_v35  ;;  %v1909_v45 = vsub.f32 %v1849_v32, %v1853_v35 }
0x1361   :  { %v853_v6 = vsel %vm852_vm12, %v1695_v3, 24 }
0x1362   :  { %v854_v36 = vsel %vm104_vm3, %v853_v6, 2147483647  ;;  %v844_v48 = vmul.f32 1.442695, %v1909_v45 }
0x1363   :  { %v856_v37 = vshra.s32 %v854_v36, 16  ;;  %v855_v7 = vand.u32 65535, %v854_v36  ;;  %v1604_v36 = vpop.eup %1603 }
0x1365   :  { %v858_v38 = vcvt.s32.f32 %v856_v37  ;;  %v857_v40 = vcvt.s32.f32 %v855_v7  ;;  %v1606_v37 = vpop.eup %1605 }
0x1366   :  { %v426_v32 = vsel %vm104_vm3, %v1606_v37, 0.0 }
0x1367   :  { %859 = vmin.xlane.f32.xlu0 %v858_v38 }
0x13f4   :  { %v860_v39 = vpop.xlane.xlu0 %859 }
0x13f5   :  { %vm861_vm0 = vcmp.eq.f32.partialorder %v858_v38, %v860_v39  ;;  %v866_v42 = vcvt.f32.s32 %v860_v39 }
0x13f6   :  { %v862_v41 = vsel %vm861_vm0, %v857_v40, inf }
0x13f7   :  { %863 = vmin.xlane.f32.xlu1 %v862_v41  ;;  %v867_v44 = vshll.u32 %v866_v42, 16 }
0x1484   :  { %v864_v43 = vpop.xlane.xlu1 %863 }
0x1485   :  { %v865_v47 = vcvt.f32.s32 %v864_v43 }
0x1487   :  { %v868_v49 = vadd.s32 %v867_v44, %v865_v47  ;;  %v1665_v47 = vmov 1966171168  }
0x1489   :  { %vm869_vm13 = vcmp.eq.s32.totalorder %v868_v49, %v1695_v3  ;;  %v1064_v49 = vunpack.c.l.s4 %v1665_v47 }
0x148a   :  { %v1424_v51 = vsel %vm869_vm13, 1.0, %v1664_v1 }
0x148b   :  { %1547 = vmatmul.mubr.msk.f32.vlgmr.msra.gmra.mrb[8].mxu0 %vm30_vm2, %v1424_v51 }
0x155e   :  { %v941_v52 = vpop.f32.mrb[8].mxu0 }
0x155f   :  { %v1548_v53 = vpop.f32.mrb[9].mxu0  ;;  %v945_v54 = vsel %vm104_vm3, %v941_v52, -inf }
0x1560   :  { %946 = vmax.xlane.f32.xlu0 %v945_v54 }
0x15ed   :  { %v947_v0 = vpop.xlane.xlu0 %946 }
0x15ee   :  { %vm957_vm14 = vcmp.eq.f32.partialorder %v941_v52, %v947_v0  ;;  %v1912_v34 = vsub.f32 %v941_v52, %v947_v0 }
0x15ef   :  { %v958_v55 = vsel %vm957_vm14, %v1695_v3, 24 }
0x15f0   :  { %v959_v56 = vsel %vm104_vm3, %v958_v55, 2147483647  ;;  %v1065_v55 = vunpack.c.0.s8 %v1064_v49 }
0x15f1   :  { %v961_v57 = vshra.s32 %v959_v56, 16  ;;  %v960_v10 = vand.u32 65535, %v959_v56  ;;  %v1067_v56 = vshrl.u32 %v25_v2, 7 }
0x15f3   :  { %v963_v58 = vcvt.s32.f32 %v961_v57  ;;  %v962_v9 = vcvt.s32.f32 %v960_v10  ;;  %v1925_v62 = vsub.s32 %v1065_v55, %v1067_v56 }
0x15f5   :  { %964 = vmin.xlane.f32.xlu1 %v963_v58 }
0x1682   :  { %v965_v30 = vpop.xlane.xlu1 %964 }
0x1683   :  { %vm966_vm15 = vcmp.eq.f32.partialorder %v963_v58, %v965_v30  ;;  %v971_v19 = vcvt.f32.s32 %v965_v30 }
0x1684   :  { %v967_v14 = vsel %vm966_vm15, %v962_v9, inf }
0x1685   :  { %968 = vmin.xlane.f32.xlu0 %v967_v14  ;;  %v972_v21 = vshll.u32 %v971_v19, 16 }
0x1689   :  { %217 = vadd.xlane.f32.xlu0 %v216_v25 }
0x168d   :  { %112 = vadd.xlane.f32.xlu0 %v111_v16 }
0x1691   :  { %532 = vadd.xlane.f32.xlu0 %v531_v5 }
0x1695   :  { %742 = vadd.xlane.f32.xlu0 %v741_v18 }
0x1712   :  { %v969_v20 = vpop.xlane.xlu0 %968 }
0x1713   :  { %v970_v22 = vcvt.f32.s32 %v969_v20 }
0x1715   :  { %v973_v23 = vadd.s32 %v972_v21, %v970_v22 }
0x1716   :  { %v218_v42 = vpop.xlane.xlu0 %217 }
0x1717   :  { %vm974_vm1 = vcmp.eq.s32.totalorder %v973_v23, %v1695_v3  ;;  %v1904_v3 = vsub.f32 %v1813_v46, %v1817_v50  ;;  %v949_v46 = vmul.f32 1.442695, %v1912_v34  ;;  %v321_v50 = vsel %vm104_vm3, %v1604_v36, 0.0 }
0x1718   :  { %v1426_v24 = vsel %vm974_vm1, 1.0, %v1664_v1 }
0x1719   :  { %1556 = vmatmul.mubr.msk.f32.vlgmr.msra.gmra.mrb[8].mxu1 %vm30_vm2, %v1426_v24  ;;  %v634_v1 = vmul.f32 1.442695, %v1904_v3 }
0x171a   :  { %v113_v43 = vpop.xlane.xlu0 %112 }
0x171b   :  { %1607 = vpow2.f32 %v634_v1 }
0x171c   :  { %1609 = vpow2.f32 %v844_v48 }
0x171d   :  { %1611 = vpow2.f32 %v949_v46 }
0x171e   :  { %1613 = vlog2.f32 %v218_v42  ;;  %v533_v44 = vpop.xlane.xlu0 %532 }
0x171f   :  { %1615 = vlog2.f32 %v113_v43 }
0x1720   :  { %1617 = vlog2.f32 %v533_v44 }
0x1722   :  { %v743_v53 = vpop.xlane.xlu0 %742 }
0x1723   :  { %1619 = vlog2.f32 %v743_v53 }
0x1725   :  { %v1608_v35 = vpop.eup %1607 }
0x1726   :  { %v636_v38 = vsel %vm104_vm3, %v1608_v35, 0.0  ;;  %v1610_v7 = vpop.eup %1609 }
0x1727   :  { %v846_v39 = vsel %vm104_vm3, %v1610_v7, 0.0  ;;  %v1612_v40 = vpop.eup %1611 }
0x1728   :  { %v951_v41 = vsel %vm104_vm3, %v1612_v40, 0.0  ;;  %v1614_v52 = vpop.eup %1613 }
0x1729   :  { %v220_v57 = vmul.f32 0.6931472, %v1614_v52  ;;  %v1616_v61 = vpop.eup %1615 }
0x172a   :  { %v115_v11 = vmul.f32 0.6931472, %v1616_v61  ;;  %v1618_v9 = vpop.eup %1617 }
0x172b   :  { %v221_v10 = vsub.f32 %v1867_v59, %v220_v57  ;;  %v535_v2 = vmul.f32 0.6931472, %v1618_v9 }
0x172c   :  { %v116_v14 = vsub.f32 %v1871_v60, %v115_v11  ;;  %v1933_v60 = vsub.s32 0, %v1067_v56 }
0x172d   :  { %v1094_v12 = vrot.slane %v221_v10, %v1925_v62  ;;  %v1620_v25 = vpop.eup %1619  ;;  %v536_v18 = vsub.f32 %v1877_v4, %v535_v2 }
0x172e   :  { %v1069_v5 = vrot.slane %v116_v14, %v1925_v62  ;;  %v745_v19 = vmul.f32 0.6931472, %v1620_v25 }
0x172f   :  { %v1095_v17 = vcombine.high %v1094_v12, %v1094_v12  ;;  %v1102_v22 = vrot.slane %v1094_v12, %v1925_v62  ;;  %v1163_v1 = vrot.slane %v536_v18, %v1925_v62 }
0x1730   :  { %v1070_v28 = vcombine.high %v1069_v5, %v1069_v5  ;;  %v746_v48 = vsub.f32 %v1882_v27, %v745_v19  ;;  %v1077_v36 = vrot.slane %v1069_v5, %v1925_v62 }
0x1731   :  { %v1109_v24 = vrot.slane %v1095_v17, %v1925_v62  ;;  %v1164_v35 = vcombine.high %v1163_v1, %v1163_v1 }
0x1732   :  { %v1084_v37 = vrot.slane %v1070_v28, %v1925_v62 }
0x1733   :  { %v1178_v55 = vrot.slane %v1164_v35, %v1925_v62 }
0x17ec   :  { %v1046_v63 = vpop.f32.mrb[8].mxu1 }
0x17ed   :  { %v1557_v8 = vpop.f32.mrb[9].mxu1  ;;  %v1050_v6 = vsel %vm104_vm3, %v1046_v63, -inf }
0x17ee   :  { %1051 = vmax.xlane.f32.xlu1 %v1050_v6  ;;  %v1299_v6 = vrot.slane %v1102_v22, %v1933_v60 }
0x17f0   :  { %v1377_v44 = vsel %vm1376_vm4, %v1077_v36, %v1299_v6 }
0x17f2   :  { %322 = vadd.xlane.f32.xlu1 %v321_v50  ;;  %v1303_v50 = vrot.slane %v1109_v24, %v1933_v60 }
0x17f6   :  { %427 = vadd.xlane.f32.xlu1 %v426_v32 }
0x17fa   :  { %637 = vadd.xlane.f32.xlu1 %v636_v38  ;;  %v1171_v38 = vrot.slane %v1163_v1, %v1925_v62 }
0x17fe   :  { %847 = vadd.xlane.f32.xlu1 %v846_v39 }
0x1802   :  { %952 = vadd.xlane.f32.xlu1 %v951_v41 }
0x187b   :  { %v1052_v51 = vpop.xlane.xlu1 %1051 }
0x187c   :  { %v1921_v54 = vsub.f32 %v1046_v63, %v1052_v51 }
0x187e   :  { %v1054_v0 = vmul.f32 1.442695, %v1921_v54 }
0x187f   :  { %v323_v58 = vpop.xlane.xlu1 %322 }
0x1880   :  { %1621 = vpow2.f32 %v1054_v0  ;;  %v1378_v0 = vsel %vm1376_vm4, %v1084_v37, %v1303_v50 }
0x1881   :  { %1623 = vlog2.f32 %v323_v58 }
0x1883   :  { %v428_v30 = vpop.xlane.xlu1 %427 }
0x1884   :  { %1625 = vlog2.f32 %v428_v30 }
0x1887   :  { %v638_v15 = vpop.xlane.xlu1 %637 }
0x1888   :  { %1627 = vlog2.f32 %v638_v15 }
0x188a   :  { %v1622_v29 = vpop.eup %1621 }
0x188b   :  { %v1624_v16 = vpop.eup %1623  ;;  %v848_v13 = vpop.xlane.xlu1 %847  ;;  %v1056_v59 = vsel %vm104_vm3, %v1622_v29, 0.0  ;;  %v1333_v29 = vrot.slane %v1178_v55, %v1933_v60 }
0x188c   :  { %v325_v20 = vmul.f32 0.6931472, %v1624_v16  ;;  %1629 = vlog2.f32 %v848_v13  ;;  %1057 = vadd.xlane.f32.xlu0 %v1056_v59 }
0x188e   :  { %v1626_v21 = vpop.eup %1625  ;;  %v326_v23 = vsub.f32 %v1894_v26, %v325_v20 }
0x188f   :  { %v430_v33 = vmul.f32 0.6931472, %v1626_v21 }
0x1890   :  { %v1117_v4 = vrot.slane %v326_v23, %v1925_v62 }
0x1891   :  { %v431_v63 = vsub.f32 %v1899_v31, %v430_v33  ;;  %v1209_v31 = vrot.slane %v746_v48, %v1925_v62 }
0x1892   :  { %v1628_v8 = vpop.eup %1627  ;;  %v1118_v46 = vcombine.high %v1117_v4, %v1117_v4  ;;  %v1125_v26 = vrot.slane %v1117_v4, %v1925_v62  ;;  %v953_v4 = vpop.xlane.xlu1 %952 }
0x1893   :  { %v1140_v32 = vrot.slane %v431_v63, %v1925_v62  ;;  %v640_v27 = vmul.f32 0.6931472, %v1628_v8  ;;  %v1210_v56 = vcombine.high %v1209_v31, %v1209_v31  ;;  %v1217_v11 = vrot.slane %v1209_v31, %v1925_v62 }
0x1894   :  { %v1132_v7 = vrot.slane %v1118_v46, %v1925_v62  ;;  %v1309_v39 = vrot.slane %v1125_v26, %v1933_v60  ;;  %1631 = vlog2.f32 %v953_v4 }
0x1895   :  { %v1141_v40 = vcombine.high %v1140_v32, %v1140_v32  ;;  %v1148_v41 = vrot.slane %v1140_v32, %v1925_v62  ;;  %v641_v42 = vsub.f32 %v1904_v3, %v640_v27  ;;  %v1329_v3 = vrot.slane %v1171_v38, %v1933_v60 }
0x1896   :  { %v1630_v43 = vpop.eup %1629  ;;  %v1313_v47 = vrot.slane %v1132_v7, %v1933_v60  ;;  %v1380_v57 = vsel %vm1379_vm5, %v1377_v44, %v1309_v39  ;;  %v1224_v16 = vrot.slane %v1210_v56, %v1925_v62  ;;  %v1349_v18 = vrot.slane %v1217_v11, %v1933_v60 }
0x1897   :  { %v1155_v49 = vrot.slane %v1141_v40, %v1925_v62  ;;  %v1319_v51 = vrot.slane %v1148_v41, %v1933_v60  ;;  %v1186_v52 = vrot.slane %v641_v42, %v1925_v62  ;;  %v850_v53 = vmul.f32 0.6931472, %v1630_v43 }
0x1898   :  { %v1381_v12 = vsel %vm1379_vm5, %v1378_v0, %v1313_v47  ;;  %v1353_v23 = vrot.slane %v1224_v16, %v1933_v60 }
0x1899   :  { %v1323_v58 = vrot.slane %v1155_v49, %v1933_v60  ;;  %v1187_v61 = vcombine.high %v1186_v52, %v1186_v52  ;;  %v1194_v10 = vrot.slane %v1186_v52, %v1925_v62  ;;  %v1383_v30 = vsel %vm1382_vm6, %v1380_v57, %v1319_v51 }
0x189a   :  { %v851_v9 = vsub.f32 %v1909_v45, %v850_v53  ;;  %v1386_v5 = vsel %vm1385_vm7, %v1383_v30, %v1329_v3 }
0x189b   :  { %v1201_v14 = vrot.slane %v1187_v61, %v1925_v62  ;;  %v1339_v15 = vrot.slane %v1194_v10, %v1933_v60  ;;  %v1384_v2 = vsel %vm1382_vm6, %v1381_v12, %v1323_v58 }
0x189c   :  { %v1232_v25 = vrot.slane %v851_v9, %v1925_v62  ;;  %v1387_v19 = vsel %vm1385_vm7, %v1384_v2, %v1333_v29 }
0x189d   :  { %v1343_v17 = vrot.slane %v1201_v14, %v1933_v60  ;;  %v1389_v45 = vsel %vm1388_vm8, %v1386_v5, %v1339_v15 }
0x189e   :  { %v1233_v13 = vcombine.high %v1232_v25, %v1232_v25  ;;  %v1240_v59 = vrot.slane %v1232_v25, %v1925_v62  ;;  %v1392_v24 = vsel %vm1391_vm9, %v1389_v45, %v1349_v18  ;;  %v1632_v8 = vpop.eup %1631 }
0x189f   :  { %v1390_v20 = vsel %vm1388_vm8, %v1387_v19, %v1343_v17  ;;  %v955_v6 = vmul.f32 0.6931472, %v1632_v8 }
0x18a0   :  { %v1247_v21 = vrot.slane %v1233_v13, %v1925_v62  ;;  %v1359_v22 = vrot.slane %v1240_v59, %v1933_v60  ;;  %v1393_v1 = vsel %vm1391_vm9, %v1390_v20, %v1353_v23 }
0x18a1   :  { %v956_v36 = vsub.f32 %v1912_v34, %v955_v6 }
0x18a2   :  { %v1363_v28 = vrot.slane %v1247_v21, %v1933_v60  ;;  %v1395_v33 = vsel %vm1394_vm10, %v1392_v24, %v1359_v22 }
0x18a3   :  { %1399 = vst.msk [vmem:[%s2015_s1] sm:$0xff] %vm30_vm2, %v1395_v33  ;;  %v1255_v50 = vrot.slane %v956_v36, %v1925_v62 }
0x18a4   :  { %v1396_v48 = vsel %vm1394_vm10, %v1393_v1, %v1363_v28 }
0x18a5   :  { %1401 = vst.msk [vmem:[%s2015_s1 + $0x10] sm:$0xff] %vm30_vm2, %v1396_v48  ;;  %v1256_v27 = vcombine.high %v1255_v50, %v1255_v50  ;;  %v1263_v31 = vrot.slane %v1255_v50, %v1925_v62 }
0x18a7   :  { %v1270_v34 = vrot.slane %v1256_v27, %v1925_v62 }
0x1919   :  { %v1058_v63 = vpop.xlane.xlu0 %1057 }
0x191a   :  { %1633 = vlog2.f32 %v1058_v63 }
0x1924   :  { %v1634_v46 = vpop.eup %1633 }
0x1925   :  { %v1060_v26 = vmul.f32 0.6931472, %v1634_v46 }
0x1927   :  { %v1061_v37 = vsub.f32 %v1921_v54, %v1060_v26 }
0x1929   :  { %v1280_v32 = vrot.slane %v1061_v37, %v1925_v62 }
0x192b   :  { %v1281_v35 = vcombine.high %v1280_v32, %v1280_v32  ;;  %v1288_v38 = vrot.slane %v1280_v32, %v1925_v62 }
0x192d   :  { %v1295_v7 = vrot.slane %v1281_v35, %v1925_v62  ;;  %v1369_v39 = vrot.slane %v1288_v38, %v1933_v60 }
0x192f   :  { %v1373_v40 = vrot.slane %v1295_v7, %v1933_v60  ;;  %v1397_v41 = vsel %vm1376_vm4, %v1263_v31, %v1369_v39 }
0x1930   :  { %1400 = vst.msk [vmem:[%s2015_s1 + $0x8] sm:$0x3] %vm104_vm3, %v1397_v41 }
0x1931   :  { %v1398_v54 = vsel %vm1376_vm4, %v1270_v34, %v1373_v40 }
0x1932   :  { %1402 = vst.msk [vmem:[%s2015_s1 + $0x18] sm:$0x3] %vm104_vm3, %v1398_v54 }
0x1933   :  { %1407 = vsyncpa [#allocation3], 1 }

</bundles_post_ra>
